<compile_context>
chip_gen: v6e
topology: v6e:2x2x1
jax: 0.10.0
libtpu: 0.0.40
codegen_flags: <defaults>
</compile_context>

<pallas_src>
import functools

import jax
import jax.numpy as jnp
from jax.experimental import pallas as pl
from jax.experimental.pallas import tpu as pltpu

LEAKY_SLOPE = 0.01   # nn.LeakyReLU default negative_slope
NORM_EPS = 1e-12     # F.normalize default eps


def _round_up(x, m):
    return ((x + m - 1) // m) * m


def _vmem_capacity_bytes():
    try:
        info = pltpu.get_tpu_info()
        cap = getattr(info, "vmem_capacity_bytes", None)
        if cap:
            return int(cap)
    except Exception:
        pass
    return 64 * 1024 * 1024   # conservative (v7x) fallback


# ----------------------------- KG TransR loss kernel -----------------------------

def _kg_loss_kernel(h_ref, pos_ref, neg_ref, remb_ref, ridx_ref, wflat_ref,
                    fold_ref, loss_ref, *, lam, n_valid):
    i = pl.program_id(0)

    @pl.when(i == 0)
    def _init():
        loss_ref[0, 0] = 0.0

    h = h_ref[...]          # (tb, E) bf16
    pos = pos_ref[...]      # (tb, E) bf16
    neg = neg_ref[...]      # (tb, E) bf16
    r_emb = remb_ref[...]   # (tb, R) f32
    tb = h.shape[0]
    r_dim = r_emb.shape[1]

    # Stack h/pos/neg -> ONE weight-stationary MXU push against W_R for all relations.
    stacked = jnp.concatenate([h, pos, neg], axis=0)                # (3*tb, E) bf16
    proj = jnp.dot(stacked, wflat_ref[...],
                   preferred_element_type=jnp.float32)              # (3*tb, n_rel*R)

    nrel_r = proj.shape[1]
    lo = ridx_ref[...] * r_dim                                      # (tb, 1) int32
    lo3 = jnp.concatenate([lo, lo, lo], axis=0)                     # (3*tb, 1)
    col = jax.lax.broadcasted_iota(jnp.int32, (3 * tb, nrel_r), 1)
    sel = ((col >= lo3) & (col < lo3 + r_dim)).astype(jnp.float32)  # per-row R-slice mask

    # Fold the masked (3*tb, n_rel*R) back to (3*tb, R) with a fixed matmul (stays on MXU).
    folded = jnp.dot(proj * sel, fold_ref[...],
                     preferred_element_type=jnp.float32)            # (3*tb, R)
    r_mul_h = folded[:tb]
    r_mul_pos = folded[tb:2 * tb]
    r_mul_neg = folded[2 * tb:]

    base = r_mul_h + r_emb
    pos_score = jnp.sum((base - r_mul_pos) ** 2, axis=1, keepdims=True)  # (tb, 1)
    neg_score = jnp.sum((base - r_mul_neg) ** 2, axis=1, keepdims=True)  # (tb, 1)

    diff = neg_score - pos_score
    # -log(sigmoid(diff)) = softplus(-diff); exp goes to the EUP slot.
    nls = jnp.maximum(-diff, 0.0) + jnp.log(1.0 + jnp.exp(-jnp.abs(diff)))

    # mask batch-padding rows
    row = jax.lax.broadcasted_iota(jnp.int32, (tb, 1), 0) + i * tb
    valid = (row < n_valid).astype(jnp.float32)
    kg_sum = jnp.sum(valid * nls)

    # _L2_loss_mean(x, multi=False) == sum(x**2) / 2  (no /B in the reference).
    # Padded rows contribute 0 (zero embeddings -> zero projections).
    l2 = 0.5 * (jnp.sum(r_mul_h ** 2) + jnp.sum(r_emb ** 2)
                + jnp.sum(r_mul_pos ** 2) + jnp.sum(r_mul_neg ** 2))

    loss_ref[0, 0] += kg_sum / n_valid + lam * l2


def kg_loss_pallas(h_e, pos_e, neg_e, r_e, r_idx, w_flat_bf16, fold, lam, *, tb=512):
    B, E = h_e.shape
    R = r_e.shape[1]
    nrel_r = w_flat_bf16.shape[1]

    tb = max(16, min(tb, _round_up(B, 16)))   # 16-aligned so bf16 sublane concat is aligned
    Bp = _round_up(B, tb)
    pad = Bp - B
    h_e = jnp.pad(h_e.astype(jnp.bfloat16), ((0, pad), (0, 0)))
    pos_e = jnp.pad(pos_e.astype(jnp.bfloat16), ((0, pad), (0, 0)))
    neg_e = jnp.pad(neg_e.astype(jnp.bfloat16), ((0, pad), (0, 0)))
    r_e = jnp.pad(r_e.astype(jnp.float32), ((0, pad), (0, 0)))
    r_idx = jnp.pad(r_idx, ((0, pad), (0, 0)))

    kern = functools.partial(_kg_loss_kernel, lam=float(lam), n_valid=int(B))
    out = pl.pallas_call(
        kern,
        out_shape=jax.ShapeDtypeStruct((1, 1), jnp.float32),
        grid=(Bp // tb,),
        in_specs=[
            pl.BlockSpec((tb, E), lambda i: (i, 0)),        # h        (bf16)
            pl.BlockSpec((tb, E), lambda i: (i, 0)),        # pos_t    (bf16)
            pl.BlockSpec((tb, E), lambda i: (i, 0)),        # neg_t    (bf16)
            pl.BlockSpec((tb, R), lambda i: (i, 0)),        # r_embed  (f32)
            pl.BlockSpec((tb, 1), lambda i: (i, 0)),        # relation index
            pl.BlockSpec((E, nrel_r), lambda i: (0, 0)),    # W_R flattened, bf16, resident
            pl.BlockSpec((nrel_r, R), lambda i: (0, 0)),    # fold matrix (resident)
        ],
        out_specs=pl.BlockSpec((1, 1), lambda i: (0, 0),
                               memory_space=pltpu.MemorySpace.SMEM),
        compiler_params=pltpu.CompilerParams(
            dimension_semantics=("arbitrary",),   # sequential: SMEM scalar accumulation
            vmem_limit_bytes=int(min(64 * 1024 * 1024, 3 * _vmem_capacity_bytes() // 4))),
    )(h_e, pos_e, neg_e, r_e, r_idx, w_flat_bf16, fold)
    return out[0, 0]


# --------------------- bi-interaction Aggregator kernel ---------------------

def _bi_interaction_kernel(adj_ref, node_ref, wbd_ref, bcat_ref, slab_ref, acc_ref):
    i = pl.program_id(0)
    k = pl.program_id(1)
    tm, tk = adj_ref.shape
    dout = slab_ref.shape[1] // 2

    @pl.when(k == 0)
    def _init():
        acc_ref[...] = jnp.zeros_like(acc_ref)

    # message passing: N_h[dst] = sum_src att[dst,src] * node[src]  (MXU, f32 accum)
    # node is fully VMEM-resident (bf16) -> slice the src block in-kernel, no re-stream.
    src0 = pl.multiple_of(k * tk, tk)
    nsrc = node_ref[pl.ds(src0, tk), :]                    # (tk, Din) bf16
    acc_ref[...] += jnp.dot(adj_ref[...], nsrc, preferred_element_type=jnp.float32)

    @pl.when(k == pl.num_programs(1) - 1)
    def _epilogue():
        dst0 = pl.multiple_of(i * tm, tm)
        node = node_ref[pl.ds(dst0, tm), :].astype(jnp.float32)   # self features (dst rows)
        nh = acc_ref[...]                                          # (tm, Din) f32
        # merged bi-interaction Linear: [x_add | x_mul] @ blockdiag(W1^T, W2^T) + [b1|b2]
        x_cat = jnp.concatenate([node + nh, node * nh], axis=1)    # (tm, 2*Din)
        y = jnp.dot(x_cat, wbd_ref[...],
                    preferred_element_type=jnp.float32) + bcat_ref[...]
        y1 = y[:, :dout]
        y2 = y[:, dout:]
        out = (jnp.where(y1 >= 0.0, y1, LEAKY_SLOPE * y1)          # LeakyReLU
               + jnp.where(y2 >= 0.0, y2, LEAKY_SLOPE * y2))       # dropout: identity (eval)
        # F.normalize(p=2, dim=1): x * rsqrt(max(||x||^2, eps^2)) -> EUP rsqrt
        sq = jnp.sum(out * out, axis=1, keepdims=True)
        normed = out * jax.lax.rsqrt(jnp.maximum(sq, NORM_EPS * NORM_EPS))
        # fused (tm, 2*dout) output slab: [out | normalized]  (wider lane stores)
        slab_ref[...] = jnp.concatenate([out, normed], axis=1)


def _agg_tile_plan(n, *, tm_cap=512, tk_cap=2048):
    """Pick (tm, tk, n_p): asymmetric tiles, bf16-aligned, >=2 row tiles, tm | tk | n_p."""
    n32 = _round_up(max(n, 32), 32)
    if n32 <= 1024:
        n_p = n32
        tk = n_p                       # single src tile (lane dim == full array dim)
        tm = n_p // 2                  # 2 row tiles -> "parallel" axis feeds both TCs
    else:
        tm, tk = tm_cap, tk_cap        # 512 x 2048 bf16 tile = 2 MiB/buffer
        n_p = _round_up(n, tk)
    return tm, tk, n_p


def bi_interaction_pallas(adj_p, node_p, wbd, bcat, *, tm, tk):
    """adj_p: (n_p, n_p) bf16 padded; node_p: (n_p, din) bf16 padded. Returns (n_p, 2*dout)."""
    n_p, din = node_p.shape
    dout = wbd.shape[1] // 2

    # explicit VMEM budget: double-buffered adj tiles + resident node + output slab + acc
    est = (2 * tm * tk * adj_p.dtype.itemsize
           + 2 * n_p * din * node_p.dtype.itemsize
           + 2 * tm * 2 * dout * 4
           + tm * din * 4
           + 2 * (2 * din) * (2 * dout) * 4 + 2 * 2 * dout * 4)
    cap = _vmem_capacity_bytes()
    vmem_limit = int(min(max(2 * est, 32 * 1024 * 1024), 3 * cap // 4))

    slab = pl.pallas_call(
        _bi_interaction_kernel,
        out_shape=jax.ShapeDtypeStruct((n_p, 2 * dout), jnp.float32),
        grid=(n_p // tm, n_p // tk),
        in_specs=[
            pl.BlockSpec((tm, tk), lambda i, k: (i, k)),             # adj[dst, src]  bf16
            pl.BlockSpec((n_p, din), lambda i, k: (0, 0)),           # node, VMEM-resident
            pl.BlockSpec((2 * din, 2 * dout), lambda i, k: (0, 0)),  # merged weight
            pl.BlockSpec((1, 2 * dout), lambda i, k: (0, 0)),        # merged bias
        ],
        out_specs=pl.BlockSpec((tm, 2 * dout), lambda i, k: (i, 0)),
        scratch_shapes=[pltpu.VMEM((tm, din), jnp.float32)],
        compiler_params=pltpu.CompilerParams(
            dimension_semantics=("parallel", "arbitrary"),
            vmem_limit_bytes=vmem_limit),
    )(adj_p, node_p, wbd, bcat)
    return slab


# ----------------------------- CF score kernel -----------------------------

def _cf_score_kernel(u_ref, itT_ref, o_ref):
    # user_embed @ item_embed.T  (item pre-transposed to (d, I) once on the host)
    o_ref[...] = jnp.dot(u_ref[...], itT_ref[...], preferred_element_type=jnp.float32)


def cf_score_pallas(user_embed, item_embed, *, tm=256, tn=512):
    u, d = user_embed.shape
    it = item_embed.shape[0]
    tm = min(tm, _round_up(u, 16))
    tn = min(tn, _round_up(it, 128))    # lane-dense, 128-multiple item tile
    up = _round_up(u, tm)
    ip = _round_up(it, tn)
    ue = jnp.pad(user_embed.astype(jnp.bfloat16), ((0, up - u), (0, 0)))
    itT = jnp.pad(item_embed.astype(jnp.bfloat16), ((0, ip - it), (0, 0))).T   # (d, ip)
    out = pl.pallas_call(
        _cf_score_kernel,
        out_shape=jax.ShapeDtypeStruct((up, ip), jnp.float32),
        grid=(up // tm, ip // tn),
        in_specs=[pl.BlockSpec((tm, d), lambda a, b: (a, 0)),
                  pl.BlockSpec((d, tn), lambda a, b: (0, b))],
        out_specs=pl.BlockSpec((tm, tn), lambda a, b: (a, b)),
        compiler_params=pltpu.CompilerParams(
            dimension_semantics=("parallel", "parallel"),
            vmem_limit_bytes=32 * 1024 * 1024),
    )(ue, itT)
    return out[:u, :it]


# ----------------------------- MetaKG (JAX) -----------------------------

class MetaKGPallas:
    def __init__(self, key, n_users, n_entities, n_relations,
                 entity_dim=32, relation_dim=32, conv_dim_list=(16, 8),
                 mess_dropout=(0.1, 0.1), aggregation_type='bi-interaction',
                 kg_l2loss_lambda=1e-5, cf_l2loss_lambda=1e-5):
        assert aggregation_type == 'bi-interaction'
        self.n_users = n_users
        self.n_entities = n_entities
        self.n_relations = n_relations
        self.entity_dim = entity_dim
        self.relation_dim = relation_dim
        self.conv_dim_list = [entity_dim] + list(conv_dim_list)
        self.n_layers = len(conv_dim_list)
        self.kg_l2loss_lambda = kg_l2loss_lambda
        self.cf_l2loss_lambda = cf_l2loss_lambda

        keys = jax.random.split(key, 3 + 4 * self.n_layers)
        # nn.Embedding default init: N(0, 1); scaled for stability
        self.relation_embed = 0.1 * jax.random.normal(
            keys[0], (n_relations, relation_dim), dtype=jnp.float32)
        self.entity_user_embed = 0.1 * jax.random.normal(
            keys[1], (n_entities + n_users, entity_dim), dtype=jnp.float32)
        # xavier_uniform with relu gain
        gain = 2.0 ** 0.5
        limit = gain * (6.0 / (entity_dim + relation_dim)) ** 0.5
        self.W_R = jax.random.uniform(
            keys[2], (n_relations, entity_dim, relation_dim),
            minval=-limit, maxval=limit, dtype=jnp.float32)

        # KG-loss kernel layout: W_R as one (E, n_rel*R) matrix (bf16) + a fixed fold
        # matrix so the kernel never materializes a per-example (B, E, R) gather.
        self.W_flat_bf16 = jnp.transpose(self.W_R, (1, 0, 2)).reshape(
            entity_dim, n_relations * relation_dim).astype(jnp.bfloat16)
        self.fold = jnp.tile(jnp.eye(relation_dim, dtype=jnp.float32),
                             (n_relations, 1))

        # Aggregator layers (bi-interaction): W1, b1, W2, b2 per layer (torch (out,in)),
        # plus the merged block-diagonal weight/bias used by the kernel.
        self.layers = []
        self.merged_layers = []
        for k in range(self.n_layers):
            din = self.conv_dim_list[k]
            dout = self.conv_dim_list[k + 1]
            bound = 1.0 / (din ** 0.5)
            base = 3 + 4 * k
            W1 = jax.random.uniform(keys[base + 0], (dout, din),
                                    minval=-bound, maxval=bound, dtype=jnp.float32)
            b1 = jax.random.uniform(keys[base + 1], (dout,),
                                    minval=-bound, maxval=bound, dtype=jnp.float32)
            W2 = jax.random.uniform(keys[base + 2], (dout, din),
                                    minval=-bound, maxval=bound, dtype=jnp.float32)
            b2 = jax.random.uniform(keys[base + 3], (dout,),
                                    minval=-bound, maxval=bound, dtype=jnp.float32)
            self.layers.append((W1, b1, W2, b2))
            wbd = jnp.zeros((2 * din, 2 * dout), jnp.float32)
            wbd = wbd.at[:din, :dout].set(W1.T)
            wbd = wbd.at[din:, dout:].set(W2.T)
            bcat = jnp.concatenate([b1, b2]).reshape(1, 2 * dout).astype(jnp.float32)
            self.merged_layers.append((wbd, bcat, din, dout))

    # --- calc_kg_loss ---
    def calc_kg_loss(self, h, r, pos_t, neg_t):
        r_embed = self.relation_embed[r]            # (B, R)
        h_embed = self.entity_user_embed[h]         # (B, E)
        pos_t_embed = self.entity_user_embed[pos_t]
        neg_t_embed = self.entity_user_embed[neg_t]
        r_idx = r.reshape(-1, 1).astype(jnp.int32)  # (B, 1)
        return kg_loss_pallas(h_embed, pos_t_embed, neg_t_embed, r_embed, r_idx,
                              self.W_flat_bf16, self.fold, self.kg_l2loss_lambda)

    # --- cf_embedding / predict ---
    def cf_embedding(self, adj, node_ids):
        ego_embed = self.entity_user_embed[node_ids]        # (n, E) f32
        n = ego_embed.shape[0]
        tm, tk, n_p = _agg_tile_plan(n)
        # pad + bf16-cast the dense attention adjacency ONCE (hoisted out of layer loop)
        adj_p = jnp.pad(adj.astype(jnp.bfloat16), ((0, n_p - n), (0, n_p - n)))
        node_p = jnp.pad(ego_embed, ((0, n_p - n), (0, 0))).astype(jnp.bfloat16)

        all_embed = [ego_embed]
        for (wbd, bcat, din, dout) in self.merged_layers:
            slab = bi_interaction_pallas(adj_p, node_p, wbd, bcat, tm=tm, tk=tk)
            all_embed.append(slab[:n, dout:])                 # F.normalize'd layer output
            node_p = slab[:, :dout].astype(jnp.bfloat16)      # next layer input, stays padded
        return jnp.concatenate(all_embed, axis=1)

    def cf_score(self, adj, node_ids, user_ids, item_ids):
        all_embed = self.cf_embedding(adj, node_ids)
        user_embed = all_embed[user_ids]
        item_embed = all_embed[item_ids]
        return cf_score_pallas(user_embed, item_embed)

    def forward(self, mode, *inputs):
        if mode == 'calc_kg_loss':
            return self.calc_kg_loss(*inputs)
        if mode == 'predict':
            return self.cf_score(*inputs)
        # TODO(synk): 'calc_att' (sparse DGL edge ops + edge_softmax) and 'meta_cf'
        #             (autograd.grad inner-loop) are not implemented as Pallas kernels.
        raise NotImplementedError(mode)


# ----------------------------- demo -----------------------------

if __name__ == "__main__":
    key = jax.random.PRNGKey(0)
    n_users, n_entities, n_relations = 8, 24, 4
    model = MetaKGPallas(key, n_users, n_entities, n_relations,
                         entity_dim=32, relation_dim=32, conv_dim_list=(16, 8))
    N = n_entities + n_users

    k1, k2, k3, k4, k5, k6 = jax.random.split(jax.random.PRNGKey(0), 6)

    # ---- calc_kg_loss ----
    B = 8
    h = jax.random.randint(k1, (B,), 0, n_entities)
    r = jax.random.randint(k2, (B,), 0, n_relations)
    pos_t = jax.random.randint(k3, (B,), 0, n_entities)
    neg_t = jax.random.randint(k4, (B,), 0, n_entities)
    kg_loss = model.forward('calc_kg_loss', h, r, pos_t, neg_t)

    # ---- predict ----
    # Dense attention adjacency (stands in for g.edata['att'] after 'calc_att'):
    # adj[dst, src], rows normalized like edge_softmax over incoming edges.
    mask = (jax.random.uniform(k5, (N, N)) < 0.3).astype(jnp.float32)
    raw = jax.random.uniform(k6, (N, N)) * mask
    adj = raw / jnp.maximum(jnp.sum(raw, axis=1, keepdims=True), 1e-12)

    node_ids = jnp.arange(N)                                     # g.ndata['id']
    user_ids = jnp.arange(n_entities, n_entities + 4)            # 4 eval users
    item_ids = jnp.arange(0, 6)                                  # 6 eval items
    score = model.forward('predict', adj, node_ids, user_ids, item_ids)

    jax.block_until_ready((kg_loss, score))
    assert score.shape == (4, 6)
    assert kg_loss.shape == ()
    print("KERNEL_OK")
</pallas_src>

<mosaic_0001>
module attributes {stable_mosaic.version = 11 : i64} {
  func.func @_kg_loss_kernel(%arg0: i32, %arg1: memref<16x32xbf16, #tpu.memory_space<vmem>>, %arg2: memref<16x32xbf16, #tpu.memory_space<vmem>>, %arg3: memref<16x32xbf16, #tpu.memory_space<vmem>>, %arg4: memref<16x32xf32, #tpu.memory_space<vmem>>, %arg5: memref<16x1xi32, #tpu.memory_space<vmem>>, %arg6: memref<32x128xbf16, #tpu.memory_space<vmem>>, %arg7: memref<128x32xf32, #tpu.memory_space<vmem>>, %arg8: memref<1x1xf32, #tpu.memory_space<smem>>) attributes {dimension_semantics = [#tpu.dimension_semantics<arbitrary>], iteration_bounds = array<i64: 1>, scalar_prefetch = 0 : i64, scratch_operands = 0 : i64, tpu.core_type = #tpu.core_type<tc>, window_params = [{transform_indices = @transform_0, window_bounds = array<i64: 16, 32>}, {transform_indices = @transform_1, window_bounds = array<i64: 16, 32>}, {transform_indices = @transform_2, window_bounds = array<i64: 16, 32>}, {transform_indices = @transform_3, window_bounds = array<i64: 16, 32>}, {transform_indices = @transform_4, window_bounds = array<i64: 16, 1>}, {pipeline_mode = #tpu.pipeline_mode<synchronous>, transform_indices = @transform_5, window_bounds = array<i64: 32, 128>}, {pipeline_mode = #tpu.pipeline_mode<synchronous>, transform_indices = @transform_6, window_bounds = array<i64: 128, 32>}, {transform_indices = @transform_7, window_bounds = array<i64: 1, 1>}]} {
    %c0_i32 = arith.constant 0 : i32
    %0 = arith.cmpi eq, %arg0, %c0_i32 : i32
    %1 = arith.extui %0 : i1 to i32
    %c0_i32_0 = arith.constant 0 : i32
    %2 = arith.cmpi ne, %1, %c0_i32_0 : i32
    scf.if %2 {
      %cst_34 = arith.constant 0.000000e+00 : f32
      %c0_35 = arith.constant 0 : index
      %c0_36 = arith.constant 0 : index
      %95 = memref.load %arg8[%c0_35, %c0_36] : memref<1x1xf32, #tpu.memory_space<smem>>
      memref.store %cst_34, %arg8[%c0_35, %c0_36] : memref<1x1xf32, #tpu.memory_space<smem>>
    } else {
    }
    %c0 = arith.constant 0 : index
    %c0_1 = arith.constant 0 : index
    %3 = vector.load %arg1[%c0, %c0_1] : memref<16x32xbf16, #tpu.memory_space<vmem>>, vector<16x32xbf16>
    %c0_2 = arith.constant 0 : index
    %c0_3 = arith.constant 0 : index
    %4 = vector.load %arg2[%c0_2, %c0_3] : memref<16x32xbf16, #tpu.memory_space<vmem>>, vector<16x32xbf16>
    %c0_4 = arith.constant 0 : index
    %c0_5 = arith.constant 0 : index
    %5 = vector.load %arg3[%c0_4, %c0_5] : memref<16x32xbf16, #tpu.memory_space<vmem>>, vector<16x32xbf16>
    %c0_6 = arith.constant 0 : index
    %c0_7 = arith.constant 0 : index
    %6 = vector.load %arg4[%c0_6, %c0_7] : memref<16x32xf32, #tpu.memory_space<vmem>>, vector<16x32xf32>
    %7 = tpu.concatenate %3, %4, %5 in 0 : vector<16x32xbf16>, vector<16x32xbf16>, vector<16x32xbf16> -> vector<48x32xbf16>
    %c0_8 = arith.constant 0 : index
    %c0_9 = arith.constant 0 : index
    %8 = vector.load %arg6[%c0_8, %c0_9] : memref<32x128xbf16, #tpu.memory_space<vmem>>, vector<32x128xbf16>
    %cst = arith.constant dense<0.000000e+00> : vector<48x128xf32>
    %9 = tpu.matmul %7, %8, %cst {dimension_numbers = #tpu.dot_dimension_numbers<[1], [0], [0], [1], [0, 0, 1, 1], [], []>} : vector<48x32xbf16>, vector<32x128xbf16>, vector<48x128xf32> -> vector<48x128xf32>
    %c0_10 = arith.constant 0 : index
    %c0_11 = arith.constant 0 : index
    %10 = vector.load %arg5[%c0_10, %c0_11] : memref<16x1xi32, #tpu.memory_space<vmem>>, vector<16x1xi32>
    %c32_i32 = arith.constant 32 : i32
    %11 = vector.broadcast %c32_i32 : i32 to vector<16x1xi32>
    %12 = arith.muli %10, %11 : vector<16x1xi32>
    %13 = tpu.concatenate %12, %12, %12 in 0 : vector<16x1xi32>, vector<16x1xi32>, vector<16x1xi32> -> vector<48x1xi32>
    %14 = tpu.iota {dimensions = array<i32: 1>} : vector<48x128xi32>
    %15 = vector.broadcast %13 : vector<48x1xi32> to vector<48x128xi32>
    %16 = arith.cmpi sge, %14, %15 : vector<48x128xi32>
    %c32_i32_12 = arith.constant 32 : i32
    %17 = vector.broadcast %c32_i32_12 : i32 to vector<48x1xi32>
    %18 = arith.addi %13, %17 : vector<48x1xi32>
    %19 = vector.broadcast %18 : vector<48x1xi32> to vector<48x128xi32>
    %20 = arith.cmpi slt, %14, %19 : vector<48x128xi32>
    %21 = arith.andi %16, %20 : vector<48x128xi1>
    %22 = arith.extui %21 : vector<48x128xi1> to vector<48x128xi32>
    %23 = arith.sitofp %22 : vector<48x128xi32> to vector<48x128xf32>
    %24 = arith.mulf %9, %23 : vector<48x128xf32>
    %c0_13 = arith.constant 0 : index
    %c0_14 = arith.constant 0 : index
    %25 = vector.load %arg7[%c0_13, %c0_14] : memref<128x32xf32, #tpu.memory_space<vmem>>, vector<128x32xf32>
    %cst_15 = arith.constant dense<0.000000e+00> : vector<48x32xf32>
    %26 = tpu.matmul %24, %25, %cst_15 {dimension_numbers = #tpu.dot_dimension_numbers<[1], [0], [0], [1], [0, 0, 1, 1], [], []>} : vector<48x128xf32>, vector<128x32xf32>, vector<48x32xf32> -> vector<48x32xf32>
    %27 = vector.extract_strided_slice %26 {offsets = [0, 0], sizes = [16, 32], strides = [1, 1]} : vector<48x32xf32> to vector<16x32xf32>
    %28 = vector.extract_strided_slice %26 {offsets = [16, 0], sizes = [16, 32], strides = [1, 1]} : vector<48x32xf32> to vector<16x32xf32>
    %29 = vector.extract_strided_slice %26 {offsets = [32, 0], sizes = [16, 32], strides = [1, 1]} : vector<48x32xf32> to vector<16x32xf32>
    %30 = arith.addf %27, %6 : vector<16x32xf32>
    %31 = arith.subf %30, %28 : vector<16x32xf32>
    %32 = arith.mulf %31, %31 : vector<16x32xf32>
    %cst_16 = arith.constant dense<0.000000e+00> : vector<16xf32>
    %33 = vector.multi_reduction <add>, %32, %cst_16 [1] : vector<16x32xf32> to vector<16xf32>
    %34 = vector.shape_cast %33 : vector<16xf32> to vector<16x1xf32>
    %35 = arith.subf %30, %29 : vector<16x32xf32>
    %36 = arith.mulf %35, %35 : vector<16x32xf32>
    %cst_17 = arith.constant dense<0.000000e+00> : vector<16xf32>
    %37 = vector.multi_reduction <add>, %36, %cst_17 [1] : vector<16x32xf32> to vector<16xf32>
    %38 = vector.shape_cast %37 : vector<16xf32> to vector<16x1xf32>
    %39 = arith.subf %38, %34 : vector<16x1xf32>
    %cst_18 = arith.constant 0.000000e+00 : f32
    %40 = vector.broadcast %cst_18 : f32 to vector<16x1xf32>
    %41 = arith.subf %40, %39 : vector<16x1xf32>
    %cst_19 = arith.constant 0.000000e+00 : f32
    %42 = vector.broadcast %cst_19 : f32 to vector<16x1xf32>
    %43 = arith.maximumf %41, %42 : vector<16x1xf32>
    %44 = math.absf %39 : vector<16x1xf32>
    %cst_20 = arith.constant 0.000000e+00 : f32
    %45 = vector.broadcast %cst_20 : f32 to vector<16x1xf32>
    %46 = arith.subf %45, %44 : vector<16x1xf32>
    %47 = math.exp %46 : vector<16x1xf32>
    %cst_21 = arith.constant 1.000000e+00 : f32
    %48 = vector.broadcast %cst_21 : f32 to vector<16x1xf32>
    %49 = arith.addf %48, %47 : vector<16x1xf32>
    %50 = math.log %49 : vector<16x1xf32>
    %51 = arith.addf %43, %50 : vector<16x1xf32>
    %52 = tpu.iota {dimensions = array<i32: 0>} : vector<16x1xi32>
    %c16_i32 = arith.constant 16 : i32
    %53 = arith.muli %arg0, %c16_i32 : i32
    %54 = vector.broadcast %53 : i32 to vector<16x1xi32>
    %55 = arith.addi %52, %54 : vector<16x1xi32>
    %c8_i32 = arith.constant 8 : i32
    %56 = vector.broadcast %c8_i32 : i32 to vector<16x1xi32>
    %57 = arith.cmpi slt, %55, %56 : vector<16x1xi32>
    %58 = arith.extui %57 : vector<16x1xi1> to vector<16x1xi32>
    %59 = arith.sitofp %58 : vector<16x1xi32> to vector<16x1xf32>
    %60 = arith.mulf %59, %51 : vector<16x1xf32>
    %61 = vector.shape_cast %60 : vector<16x1xf32> to vector<1x16x1xf32>
    %cst_22 = arith.constant dense<0.000000e+00> : vector<1xf32>
    %62 = vector.multi_reduction <add>, %61, %cst_22 [1, 2] : vector<1x16x1xf32> to vector<1xf32>
    %63 = vector.shape_cast %62 : vector<1xf32> to vector<1x1x1xf32>
    %64 = vector.extract %63[0, 0, 0] : f32 from vector<1x1x1xf32>
    %65 = arith.mulf %27, %27 : vector<16x32xf32>
    %66 = vector.shape_cast %65 : vector<16x32xf32> to vector<1x16x32xf32>
    %cst_23 = arith.constant dense<0.000000e+00> : vector<1xf32>
    %67 = vector.multi_reduction <add>, %66, %cst_23 [1, 2] : vector<1x16x32xf32> to vector<1xf32>
    %68 = vector.shape_cast %67 : vector<1xf32> to vector<1x1x1xf32>
    %69 = vector.extract %68[0, 0, 0] : f32 from vector<1x1x1xf32>
    %70 = arith.mulf %6, %6 : vector<16x32xf32>
    %71 = vector.shape_cast %70 : vector<16x32xf32> to vector<1x16x32xf32>
    %cst_24 = arith.constant dense<0.000000e+00> : vector<1xf32>
    %72 = vector.multi_reduction <add>, %71, %cst_24 [1, 2] : vector<1x16x32xf32> to vector<1xf32>
    %73 = vector.shape_cast %72 : vector<1xf32> to vector<1x1x1xf32>
    %74 = vector.extract %73[0, 0, 0] : f32 from vector<1x1x1xf32>
    %75 = arith.addf %69, %74 : f32
    %76 = arith.mulf %28, %28 : vector<16x32xf32>
    %77 = vector.shape_cast %76 : vector<16x32xf32> to vector<1x16x32xf32>
    %cst_25 = arith.constant dense<0.000000e+00> : vector<1xf32>
    %78 = vector.multi_reduction <add>, %77, %cst_25 [1, 2] : vector<1x16x32xf32> to vector<1xf32>
    %79 = vector.shape_cast %78 : vector<1xf32> to vector<1x1x1xf32>
    %80 = vector.extract %79[0, 0, 0] : f32 from vector<1x1x1xf32>
    %81 = arith.addf %75, %80 : f32
    %82 = arith.mulf %29, %29 : vector<16x32xf32>
    %83 = vector.shape_cast %82 : vector<16x32xf32> to vector<1x16x32xf32>
    %cst_26 = arith.constant dense<0.000000e+00> : vector<1xf32>
    %84 = vector.multi_reduction <add>, %83, %cst_26 [1, 2] : vector<1x16x32xf32> to vector<1xf32>
    %85 = vector.shape_cast %84 : vector<1xf32> to vector<1x1x1xf32>
    %86 = vector.extract %85[0, 0, 0] : f32 from vector<1x1x1xf32>
    %87 = arith.addf %81, %86 : f32
    %cst_27 = arith.constant 5.000000e-01 : f32
    %88 = arith.mulf %cst_27, %87 : f32
    %c0_28 = arith.constant 0 : index
    %c0_29 = arith.constant 0 : index
    %89 = memref.load %arg8[%c0_28, %c0_29] : memref<1x1xf32, #tpu.memory_space<smem>>
    %cst_30 = arith.constant 8.000000e+00 : f32
    %90 = arith.divf %64, %cst_30 : f32
    %cst_31 = arith.constant 9.99999974E-6 : f32
    %91 = arith.mulf %cst_31, %88 : f32
    %92 = arith.addf %90, %91 : f32
    %93 = arith.addf %89, %92 : f32
    %c0_32 = arith.constant 0 : index
    %c0_33 = arith.constant 0 : index
    %94 = memref.load %arg8[%c0_32, %c0_33] : memref<1x1xf32, #tpu.memory_space<smem>>
    memref.store %93, %arg8[%c0_32, %c0_33] : memref<1x1xf32, #tpu.memory_space<smem>>
    return
  }
  func.func @transform_0(%arg0: i32) -> (i32, i32) {
    %c0_i32 = arith.constant 0 : i32
    %c0_i32_0 = arith.constant 0 : i32
    return %arg0, %c0_i32 : i32, i32
  }
  func.func @transform_1(%arg0: i32) -> (i32, i32) {
    %c0_i32 = arith.constant 0 : i32
    %c0_i32_0 = arith.constant 0 : i32
    return %arg0, %c0_i32 : i32, i32
  }
  func.func @transform_2(%arg0: i32) -> (i32, i32) {
    %c0_i32 = arith.constant 0 : i32
    %c0_i32_0 = arith.constant 0 : i32
    return %arg0, %c0_i32 : i32, i32
  }
  func.func @transform_3(%arg0: i32) -> (i32, i32) {
    %c0_i32 = arith.constant 0 : i32
    %c0_i32_0 = arith.constant 0 : i32
    return %arg0, %c0_i32 : i32, i32
  }
  func.func @transform_4(%arg0: i32) -> (i32, i32) {
    %c0_i32 = arith.constant 0 : i32
    %c0_i32_0 = arith.constant 0 : i32
    return %arg0, %c0_i32 : i32, i32
  }
  func.func @transform_5(%arg0: i32) -> (i32, i32) {
    %c0_i32 = arith.constant 0 : i32
    %c0_i32_0 = arith.constant 0 : i32
    %c0_i32_1 = arith.constant 0 : i32
    return %c0_i32, %c0_i32_0 : i32, i32
  }
  func.func @transform_6(%arg0: i32) -> (i32, i32) {
    %c0_i32 = arith.constant 0 : i32
    %c0_i32_0 = arith.constant 0 : i32
    %c0_i32_1 = arith.constant 0 : i32
    return %c0_i32, %c0_i32_0 : i32, i32
  }
  func.func @transform_7(%arg0: i32) -> (i32, i32) {
    %c0_i32 = arith.constant 0 : i32
    %c0_i32_0 = arith.constant 0 : i32
    %c0_i32_1 = arith.constant 0 : i32
    return %c0_i32, %c0_i32_0 : i32, i32
  }
}

</mosaic_0001>

<bundles_post_ra>
// kernel: tpu_custom_call.1
= control target key start
LH: loop header
LB: loop body
LE: loop exit
PB: predicated region body
PF: predicated region fallthrough
CT: control target
= control target key end

     0   :  { %v575_v1 = vmov 0.0   ;;  %vm576_vm0 = vmmov 0   ;;  %v577_v4 = vmov 0   ;;  %vm73_vm1 = vcmask 261120   ;;  %s722_s0 = inlined_call_operand.vmem [shape: bf16[16,32], index: 0, kind: input, shape index: {}]   ;;  %s723_s1 = inlined_call_operand.vmem [shape: bf16[16,32], index: 1, kind: input, shape index: {}]   ;;  %s724_s2 = inlined_call_operand.vmem [shape: bf16[16,32], index: 2, kind: input, shape index: {}]   ;;  %s725_s3 = inlined_call_operand.vmem [shape: f32[16,32], index: 3, kind: input, shape index: {}]   ;;  %s726_s4 = inlined_call_operand.vmem [shape: s32[16,1], index: 4, kind: input, shape index: {}]   ;;  %s727_s5 = inlined_call_operand.vmem [shape: bf16[32,128], index: 5, kind: input, shape index: {}]   ;;  %s728_s6 = inlined_call_operand.vmem [shape: f32[128,32], index: 6, kind: input, shape index: {}]   ;;  %s729_s7 = inlined_call_operand.hbm [shape: f32[1,1], index: 7, kind: output, shape index: {}]  }
   0x1   :  { %v552_v0 = vld [vmem:[%s727_s5 + $0x8] sm:$0xff]   ;;  %478 = vmatprep.subr.bf16.mxu0 %v575_v1  ;;  %v553_v2 = vld [vmem:[%s727_s5] sm:$0xff]   ;;  %482 = vmatprep.mubr.msk.bf16.mxu0 %vm576_vm0, %v575_v1  ;;  %v191_v7 = vld [vmem:[%s728_s6 + $0x78] sm:$0xff] }
   0x2   :  { %479 = vmatpush3.bf16.msra.mxu0 %v552_v0  ;;  %v554_v3 = vld [vmem:[%s722_s0] sm:$0xff]   ;;  %550 = vset.pattern.permute.xlu0 %v577_v4  ;;  %v141_v6 = vld [vmem:[%s726_s4 + $0x8] sm:$0xff]  ;;  %v190_v10 = vld [vmem:[%s728_s6 + $0x70] sm:$0xff] }
   0x3   :  { %480 = vmatprep.subr.bf16.mxu0 %v575_v1  ;;  %551 = vset.pattern.permute.xlu1 %v577_v4  ;;  %v140_v5 = vld [vmem:[%s726_s4] sm:$0xff]  ;;  %v143_v9 = vmul.u32 32, %v141_v6  ;;  %v189_v13 = vld [vmem:[%s728_s6 + $0x68] sm:$0xff] }
   0x4   :  { %v142_v8 = vmul.u32 32, %v140_v5  ;;  %494 = vmatprep.subr.mxu1 %v191_v7 }
   0x5   :  { %495 = vmatpush3.msra.mxu1 %v191_v7  ;;  %150 = vperm.xlu1 %551, %v143_v9   ;;  %v155_v12 = vadd.s32 32, %v143_v9 }
   0x6   :  { %481 = vmatpush3.bf16.msra.mxu0 %v553_v2  ;;  %147 = vperm.xlu0 %550, %v142_v8   ;;  %v154_v11 = vadd.s32 32, %v142_v8 }
   0x7   :  { %496 = vmatprep.subr.mxu1 %v190_v10 }
   0x8   :  { %497 = vmatpush3.msra.mxu1 %v190_v10 }
   0x9   :  { %483 = vmatmul.mubr.msk.bf16.vlgmr.msra.gmra.mxu0 %vm73_vm1, %v554_v3 }
   0xa   :  { %486 = vmatprep.mubr.msk.bf16.mxu0 %vm576_vm0, %v575_v1 }
   0xb   :  { %12 = vsyncpa [#allocation3], 0  ;;  %498 = vmatprep.subr.mxu1 %v189_v13  ;;  %v188_v14 = vld [vmem:[%s728_s6 + $0x60] sm:$0xff]  ;;  %157 = vperm.xlu0 %550, %v154_v11   ;;  %v187_v16 = vld [vmem:[%s728_s6 + $0x58] sm:$0xff]  ;;  %v144_v30 = vlaneseq  ;;  %vm346_vm8 = vcmask 7168   ;;  %s578_s29 = smov [#allocation2]  }
   0xc   :  { %160 = vperm.xlu1 %551, %v155_v12   ;;  %v555_v15 = vld [vmem:[%s723_s1] sm:$0xff]   ;;  %499 = vmatpush3.msra.mxu1 %v189_v13  ;;  %v186_v17 = vld [vmem:[%s728_s6 + $0x50] sm:$0xff]  ;;  %v185_v18 = vld [vmem:[%s728_s6 + $0x48] sm:$0xff] }
   0xd   :  { %500 = vmatprep.subr.mxu1 %v188_v14  ;;  %v184_v19 = vld [vmem:[%s728_s6 + $0x40] sm:$0xff]  ;;  %v183_v21 = vld [vmem:[%s728_s6 + $0x38] sm:$0xff]  ;;  %v182_v22 = vld [vmem:[%s728_s6 + $0x30] sm:$0xff]  ;;  %v145_v32 = vand.u32 127, %v144_v30 }
   0xe   :  { %501 = vmatpush3.msra.mxu1 %v188_v14  ;;  %v556_v20 = vld [vmem:[%s724_s2] sm:$0xff]   ;;  %v181_v23 = vld [vmem:[%s728_s6 + $0x28] sm:$0xff]  ;;  %v179_v25 = vld [vmem:[%s728_s6 + $0x18] sm:$0xff] }
   0xf   :  { %502 = vmatprep.subr.mxu1 %v187_v16  ;;  %v180_v24 = vld [vmem:[%s728_s6 + $0x20] sm:$0xff]  ;;  %v178_v26 = vld [vmem:[%s728_s6 + $0x10] sm:$0xff]  ;;  %v177_v27 = vld [vmem:[%s728_s6 + $0x8] sm:$0xff] }
  0x10   :  { %503 = vmatpush3.msra.mxu1 %v187_v16  ;;  %v176_v28 = vld [vmem:[%s728_s6] sm:$0xff]  ;;  %v41_v56 = vld [vmem:[%s725_s3 + $0x8] sm:$0xff] }
  0x11   :  { %487 = vmatmul.mubr.msk.bf16.gmra.mxu0 %vm73_vm1, %v555_v15  ;;  %504 = vmatprep.subr.mxu1 %v186_v17  ;;  %v40_v57 = vld [vmem:[%s725_s3] sm:$0xff] }
  0x12   :  { %490 = vmatprep.mubr.msk.bf16.mxu0 %vm576_vm0, %v575_v1  ;;  %505 = vmatpush3.msra.mxu1 %v186_v17 }
  0x13   :  { %506 = vmatprep.subr.mxu1 %v185_v18 }
  0x14   :  { %507 = vmatpush3.msra.mxu1 %v185_v18 }
  0x15   :  { %508 = vmatprep.subr.mxu1 %v184_v19 }
  0x16   :  { %509 = vmatpush3.msra.mxu1 %v184_v19 }
  0x17   :  { %510 = vmatprep.subr.mxu1 %v183_v21 }
  0x18   :  { %511 = vmatpush3.msra.mxu1 %v183_v21 }
  0x19   :  { %491 = vmatmul.mubr.msk.bf16.gmra.mxu0 %vm73_vm1, %v556_v20  ;;  %512 = vmatprep.subr.mxu1 %v182_v22 }
  0x1a   :  { %513 = vmatpush3.msra.mxu1 %v182_v22 }
  0x1b   :  { %514 = vmatprep.subr.mxu1 %v181_v23 }
  0x1c   :  { %515 = vmatpush3.msra.mxu1 %v181_v23 }
  0x1d   :  { %516 = vmatprep.subr.mxu1 %v180_v24 }
  0x1e   :  { %517 = vmatpush3.msra.mxu1 %v180_v24 }
  0x1f   :  { %518 = vmatprep.subr.mxu1 %v179_v25 }
  0x20   :  { %519 = vmatpush3.msra.mxu1 %v179_v25 }
  0x21   :  { %520 = vmatprep.subr.mxu1 %v178_v26 }
  0x22   :  { %521 = vmatpush3.msra.mxu1 %v178_v26 }
  0x23   :  { %522 = vmatprep.subr.mxu1 %v177_v27 }
  0x24   :  { %523 = vmatpush3.msra.mxu1 %v177_v27 }
  0x25   :  { %524 = vmatprep.subr.mxu1 %v176_v28 }
  0x26   :  { %525 = vmatpush3.msra.mxu1 %v176_v28  ;;  %v374_v28 = vmul.f32 %v41_v56, %v41_v56 }
  0x80   :  { %v151_v31 = vpop.permute.xlu1 %150 }
  0x81   :  { %v148_v29 = vpop.permute.xlu0 %147  ;;  %vm153_vm5 = vcmp.ge.s32.totalorder %v145_v32, %v151_v31  ;;  %v376_v31 = vsel %vm73_vm1, %v374_v28, 0.0 }
  0x82   :  { %vm152_vm2 = vcmp.ge.s32.totalorder %v145_v32, %v148_v29  ;;  %v373_v29 = vmul.f32 %v40_v57, %v40_v57 }
  0x84   :  { %v375_v30 = vsel %vm73_vm1, %v373_v29, 0.0 }
  0x86   :  { %v158_v33 = vpop.permute.xlu0 %157 }
  0x87   :  { %vm162_vm3 = vcmp.lt.s32.totalorder %v145_v32, %v158_v33  ;;  %v161_v34 = vpop.permute.xlu1 %160 }
  0x88   :  { %vm164_vm4 = vmand %vm152_vm2, %vm162_vm3  ;;  %vm163_vm6 = vcmp.lt.s32.totalorder %v145_v32, %v161_v34  ;;  %v377_v32 = vadd.f32 %v376_v31, %v375_v30 }
  0x89   :  { %v449_v35 = vsel %vm164_vm4, 1.0, %v575_v1  ;;  %vm165_vm7 = vmand %vm153_vm5, %vm163_vm6 }
  0x8a   :  { %v450_v38 = vsel %vm165_vm7, 1.0, %v575_v1 }
  0xc9   :  { %v117_v36 = vpop.f32.mrf.mxu0 }
  0xca   :  { %v170_v37 = vmul.f32 %v449_v35, %v117_v36 }
  0xcb   :  { %v484_v39 = vpop.f32.mrf.mxu0 }
  0xcc   :  { %526 = vmatprep.mubr.f32.mxu1 %v170_v37 }
  0xcd   :  { %v120_v40 = vpop.f32.mrf.mxu0 }
  0xce   :  { %v171_v41 = vmul.f32 %v450_v38, %v120_v40 }
  0xcf   :  { %v485_v42 = vpop.f32.mrf.mxu0 }
  0xd0   :  { %527 = vmatmul.mubr.f32.vlgmr.msra.gmra.mxu1 %v171_v41 }
  0xd1   :  { %v125_v43 = vpop.f32.mrf.mxu0 }
  0xd2   :  { %v172_v44 = vmul.f32 %v449_v35, %v125_v43 }
  0xd3   :  { %v488_v45 = vpop.f32.mrf.mxu0 }
  0xd4   :  { %529 = vmatprep.mubr.f32.mxu1 %v172_v44 }
  0xd5   :  { %v128_v46 = vpop.f32.mrf.mxu0 }
  0xd6   :  { %v173_v47 = vmul.f32 %v450_v38, %v128_v46 }
  0xd7   :  { %v489_v48 = vpop.f32.mrf.mxu0 }
  0xd8   :  { %530 = vmatmul.mubr.f32.gmra.mxu1 %v173_v47 }
  0xd9   :  { %v133_v49 = vpop.f32.mrf.mxu0 }
  0xda   :  { %v174_v50 = vmul.f32 %v449_v35, %v133_v49 }
  0xdb   :  { %v492_v51 = vpop.f32.mrf.mxu0 }
  0xdc   :  { %532 = vmatprep.mubr.f32.mxu1 %v174_v50 }
  0xdd   :  { %v136_v52 = vpop.f32.mrf.mxu0 }
  0xde   :  { %v175_v53 = vmul.f32 %v450_v38, %v136_v52 }
  0xdf   :  { %v493_v54 = vpop.f32.mrf.mxu0 }
  0xe0   :  { %533 = vmatmul.mubr.f32.gmra.mxu1 %v175_v53 }
 0x190   :  { %v528_v55 = vpop.f32.mrf.mxu1 }
 0x191   :  { %v288_v59 = vadd.f32 %v528_v55, %v41_v56  ;;  %v360_v13 = vmul.f32 %v528_v55, %v528_v55 }
 0x192   :  { %v258_v58 = vpop.f32.mrf.mxu1 }
 0x193   :  { %v287_v61 = vadd.f32 %v258_v58, %v40_v57  ;;  %v359_v9 = vmul.f32 %v258_v58, %v258_v58  ;;  %v362_v23 = vsel %vm73_vm1, %v360_v13, 0.0 }
 0x195   :  { %v361_v21 = vsel %vm73_vm1, %v359_v9, 0.0 }
 0x196   :  { %v363_v24 = vadd.f32 %v362_v23, %v361_v21 }
 0x198   :  { %v531_v60 = vpop.f32.mrf.mxu1 }
 0x199   :  { %v290_v62 = vsub.f32 %v288_v59, %v531_v60  ;;  %v389_v22 = vmul.f32 %v531_v60, %v531_v60 }
 0x19a   :  { %v268_v63 = vpop.f32.mrf.mxu1 }
 0x19b   :  { %v292_v0 = vmul.f32 %v290_v62, %v290_v62  ;;  %v289_v1 = vsub.f32 %v287_v61, %v268_v63  ;;  %v388_v19 = vmul.f32 %v268_v63, %v268_v63  ;;  %v391_v26 = vsel %vm73_vm1, %v389_v22, 0.0 }
 0x19d   :  { %v291_v2 = vmul.f32 %v289_v1, %v289_v1  ;;  %v296_v3 = vsel %vm73_vm1, %v292_v0, 0.0  ;;  %v390_v25 = vsel %vm73_vm1, %v388_v19, 0.0 }
 0x19e   :  { %297 = vadd.xlane.f32.xlu0 %v296_v3  ;;  %v392_v27 = vadd.f32 %v391_v26, %v390_v25 }
 0x19f   :  { %v293_v7 = vsel %vm73_vm1, %v291_v2, 0.0 }
 0x1a0   :  { %v534_v4 = vpop.f32.mrf.mxu1 }
 0x1a1   :  { %v300_v5 = vsub.f32 %v288_v59, %v534_v4  ;;  %v404_v6 = vmul.f32 %v534_v4, %v534_v4 }
 0x1a2   :  { %294 = vadd.xlane.f32.xlu0 %v293_v7  ;;  %v278_v8 = vpop.f32.mrf.mxu1 }
 0x1a3   :  { %v302_v10 = vmul.f32 %v300_v5, %v300_v5  ;;  %v299_v11 = vsub.f32 %v287_v61, %v278_v8  ;;  %v403_v12 = vmul.f32 %v278_v8, %v278_v8  ;;  %v406_v17 = vsel %vm73_vm1, %v404_v6, 0.0 }
 0x1a5   :  { %v301_v14 = vmul.f32 %v299_v11, %v299_v11  ;;  %v306_v15 = vsel %vm73_vm1, %v302_v10, 0.0  ;;  %v405_v16 = vsel %vm73_vm1, %v403_v12, 0.0 }
 0x1a6   :  { %307 = vadd.xlane.f32.xlu1 %v306_v15  ;;  %v407_v18 = vadd.f32 %v406_v17, %v405_v16 }
 0x1a7   :  { %v303_v20 = vsel %vm73_vm1, %v301_v14, 0.0 }
 0x1a8   :  { %304 = vadd.xlane.f32.xlu0 %v303_v20 }
 0x1aa   :  { %378 = vadd.xlane.f32.xlu1 %v377_v32 }
 0x1ac   :  { %364 = vadd.xlane.f32.xlu0 %v363_v24 }
 0x1b0   :  { %393 = vadd.xlane.f32.xlu0 %v392_v27 }
 0x227   :  { %v298_v33 = vpop.xlane.xlu0 %297 }
 0x22b   :  { %v295_v34 = vpop.xlane.xlu0 %294 }
 0x22f   :  { %v308_v35 = vpop.xlane.xlu1 %307 }
 0x230   :  { %v310_v36 = vsub.f32 %v308_v35, %v298_v33 }
 0x231   :  { %v305_v37 = vpop.xlane.xlu0 %304 }
 0x232   :  { %v316_v38 = vand.u32 2147483647, %v310_v36  ;;  %v309_v39 = vsub.f32 %v305_v37, %v295_v34  ;;  %v312_v49 = vsub.f32 0.0, %v310_v36 }
 0x233   :  { %v379_v0 = vpop.xlane.xlu1 %378 }
 0x234   :  { %v318_v40 = vsub.f32 0.0, %v316_v38  ;;  %v315_v41 = vand.u32 2147483647, %v309_v39  ;;  %v311_v50 = vsub.f32 0.0, %v309_v39  ;;  %v314_v52 = vmax.f32 %v312_v49, 0.0 }
 0x235   :  { %v365_v63 = vpop.xlane.xlu0 %364  ;;  %v380_v3 = vrot.slane %v379_v0, 4 }
 0x236   :  { %v321_v42 = vmul.f32 1.442695, %v318_v40  ;;  %v317_v43 = vsub.f32 0.0, %v315_v41  ;;  %v313_v55 = vmax.f32 %v311_v50, 0.0  ;;  %v366_v2 = vrot.slane %v365_v63, 4 }
 0x237   :  { %v381_v6 = vadd.f32 %v380_v3, %v379_v0 }
 0x238   :  { %557 = vpow2.f32 %v321_v42  ;;  %v319_v44 = vmul.f32 1.442695, %v317_v43  ;;  %v367_v5 = vadd.f32 %v366_v2, %v365_v63 }
 0x239   :  { %v394_v1 = vpop.xlane.xlu0 %393  ;;  %v382_v10 = vrot.slane %v381_v6, 2 }
 0x23a   :  { %559 = vpow2.f32 %v319_v44  ;;  %v395_v4 = vrot.slane %v394_v1, 4  ;;  %v368_v8 = vrot.slane %v367_v5, 2 }
 0x23c   :  { %v396_v7 = vadd.f32 %v395_v4, %v394_v1  ;;  %v369_v15 = vadd.f32 %v368_v8, %v367_v5 }
 0x23e   :  { %v397_v12 = vrot.slane %v396_v7, 2  ;;  %v370_v22 = vrot.slane %v369_v15, 1 }
 0x240   :  { %v398_v19 = vadd.f32 %v397_v12, %v396_v7  ;;  %v371_v29 = vadd.f32 %v370_v22, %v369_v15 }
 0x242   :  { %v399_v26 = vrot.slane %v398_v19, 1 }
 0x244   :  { %v400_v32 = vadd.f32 %v399_v26, %v398_v19 }
 0x245   :  { %v558_v45 = vpop.eup %557 }
 0x246   :  { %v324_v46 = vadd.f32 1.0, %v558_v45 }
 0x247   :  { %v560_v47 = vpop.eup %559 }
 0x248   :  { %561 = vlog2.f32 %v324_v46  ;;  %v323_v48 = vadd.f32 1.0, %v560_v47 }
 0x24a   :  { %563 = vlog2.f32 %v323_v48 }
 0x255   :  { %v562_v51 = vpop.eup %561 }
 0x256   :  { %v328_v53 = vmul.f32 0.6931472, %v562_v51 }
 0x257   :  { %v564_v54 = vpop.eup %563 }
 0x258   :  { %v326_v56 = vmul.f32 0.6931472, %v564_v54  ;;  %v330_v57 = vadd.f32 %v328_v53, %v314_v52 }
 0x25a   :  { %v329_v58 = vadd.f32 %v326_v56, %v313_v55  ;;  %v345_v59 = vmul.f32 0.0, %v330_v57 }
 0x25c   :  { %v347_v60 = vsel %vm346_vm8, %v329_v58, 0.0  ;;  %v348_v61 = vsel %vm346_vm8, %v345_v59, 0.0 }
 0x25d   :  { %v349_v62 = vadd.f32 %v348_v61, %v347_v60 }
 0x25f   :  { %350 = vadd.xlane.f32.xlu1 %v349_v62 }
 0x263   :  { %408 = vadd.xlane.f32.xlu1 %v407_v18  ;;  %v383_v18 = vadd.f32 %v382_v10, %v381_v6 }
 0x265   :  { %v384_v25 = vrot.slane %v383_v18, 1 }
 0x267   :  { %v385_v30 = vadd.f32 %v384_v25, %v383_v18 }
 0x2e8   :  { %v351_v9 = vpop.xlane.xlu1 %350 }
 0x2e9   :  { %v352_v11 = vrot.slane %v351_v9, 4 }
 0x2eb   :  { %v353_v13 = vadd.f32 %v352_v11, %v351_v9 }
 0x2ec   :  { %v409_v14 = vpop.xlane.xlu1 %408 }
 0x2ed   :  { %v354_v16 = vrot.slane %v353_v13, 2  ;;  %v410_v17 = vrot.slane %v409_v14, 4 }
 0x2ef   :  { %v411_v20 = vadd.f32 %v410_v17, %v409_v14  ;;  %v355_v21 = vadd.f32 %v354_v16, %v353_v13 }
 0x2f1   :  { %v412_v23 = vrot.slane %v411_v20, 2  ;;  %v356_v24 = vrot.slane %v355_v21, 1 }
 0x2f3   :  { %v413_v27 = vadd.f32 %v412_v23, %v411_v20  ;;  %v357_v28 = vadd.f32 %v356_v24, %v355_v21 }
 0x2f5   :  { %535 = vpush %v357_v28  ;;  %v414_v31 = vrot.slane %v413_v27, 1 }
 0x2f6   :  { %537 = vpush %v371_v29 }
 0x2f7   :  { %539 = vpush %v385_v30  ;;  %v415_v33 = vadd.f32 %v414_v31, %v413_v27 }
 0x2f8   :  { %541 = vpush %v400_v32 }
 0x2f9   :  { %543 = vpush %v415_v33 }
 0x326   :  { %s536_s3 = spop %535 }
 0x327   :  { %s538_s19 = spop %537  ;;  %s422_s26 = smul.f32 0.125, %s536_s3 }
 0x328   :  { %s540_s20 = spop %539 }
 0x329   :  { %s387_s21 = sadd.f32 %s540_s20, %s538_s19  ;;  %s542_s22 = spop %541 }
 0x32a   :  { %s544_s23 = spop %543 }
 0x32b   :  { %s402_s1 = sadd.f32 %s542_s22, %s387_s21 }
 0x32d   :  { %s417_s24 = sadd.f32 %s544_s23, %s402_s1 }
 0x32f   :  { %s418_s25 = smul.f32 0.5, %s417_s24 }
 0x331   :  { %s423_s27 = smul.f32 1e-05, %s418_s25 }
 0x333   :  { %s424_s28 = sadd.f32 %s423_s27, %s422_s26 }
 0x335   :  { %427 = sst [smem:[#allocation2]] %s424_s28 }
 0x336   :  { %435 = dma.smem_to_hbm %s578_s29, 16, %s729_s7, [#allocation3]  }
 0x337   :  { %573 = dma.done.wait [#allocation3], 16  }
 0x338   :  { %574 = vsyncadd [#allocation3], 4294967280 }
 0x339   :  { %439 = sfence }
 0x33a   :  { %440 = vsyncpa [#allocation3], 1 }

</bundles_post_ra>
